<compile_context>
chip_gen: v6e
topology: v6e:2x2x1
jax: 0.10.0
libtpu: 0.0.40
codegen_flags: <defaults>
</compile_context>

<pallas_src>
import functools

import jax
import jax.numpy as jnp
from jax.experimental import pallas as pl
from jax.experimental.pallas import tpu as pltpu


# ------------------------- Fused Pallas kernel -------------------------

def _fused_gcn_kernel(num_extra,
                      a_ref, deg_ref, w1_ref, b1_ref, ws_ref, bs_ref,
                      l1w_ref, l1b_ref, l2w_ref, l2b_ref,
                      o_ref, x_ref):
    # conv1 with X = ones((N, 1)):
    #   A_norm @ (ones @ W1) + b1 == rowsum(A_norm)[:, None] * W1 + b1
    # No MXU pass for the K=1 contraction; runs on the VPU.
    x_ref[...] = deg_ref[...] * w1_ref[...] + b1_ref[...]

    a_bf16 = a_ref[...]  # adjacency already stored as bf16

    # Remaining GCN layers, statically unrolled; X stays resident in VMEM.
    for l in range(num_extra):
        xw = jnp.dot(x_ref[...].astype(jnp.bfloat16), ws_ref[l],
                     preferred_element_type=jnp.float32)
        x_ref[...] = (jnp.dot(a_bf16, xw.astype(jnp.bfloat16),
                              preferred_element_type=jnp.float32)
                      + bs_ref[l])

    # global_add_pool(batch=None): sum over all nodes -> (1, H_pad)
    pooled = jnp.sum(x_ref[...], axis=0, keepdims=True)

    # lin1 + ReLU
    h = (jnp.dot(pooled.astype(jnp.bfloat16), l1w_ref[...],
                 preferred_element_type=jnp.float32) + l1b_ref[...])
    h = jnp.maximum(h, 0.0)
    # F.dropout(p=0.5, training=False) is the identity in eval mode.
    # TODO(synk): training-mode dropout (random mask) is not implemented.

    # lin2, padded to a lane-dense (1, 128) output; only column 0 is real.
    o_ref[...] = (jnp.dot(h.astype(jnp.bfloat16), l2w_ref[...],
                          preferred_element_type=jnp.float32) + l2b_ref[...])


def fused_basic_gcn(a_bf16, deg, w1p, b1p, wsp, bsp, l1wp, l1bp, l2wp, l2bp):
    n = a_bf16.shape[0]
    hp = w1p.shape[1]
    op = l2wp.shape[1]
    num_extra = wsp.shape[0]
    kernel = functools.partial(_fused_gcn_kernel, num_extra)
    out = pl.pallas_call(
        kernel,
        grid=(1,),
        in_specs=[
            pl.BlockSpec((n, n), lambda i: (0, 0)),                 # A_norm (bf16)
            pl.BlockSpec((n, 1), lambda i: (0, 0)),                 # rowsum(A_norm)
            pl.BlockSpec((1, hp), lambda i: (0, 0)),                # W1 (padded)
            pl.BlockSpec((1, hp), lambda i: (0, 0)),                # b1 (padded)
            pl.BlockSpec((num_extra, hp, hp), lambda i: (0, 0, 0)),  # stacked conv Ws
            pl.BlockSpec((num_extra, 1, hp), lambda i: (0, 0, 0)),   # stacked conv bs
            pl.BlockSpec((hp, hp), lambda i: (0, 0)),               # lin1 W
            pl.BlockSpec((1, hp), lambda i: (0, 0)),                # lin1 b
            pl.BlockSpec((hp, op), lambda i: (0, 0)),               # lin2 W (padded)
            pl.BlockSpec((1, op), lambda i: (0, 0)),                # lin2 b (padded)
        ],
        out_specs=pl.BlockSpec((1, op), lambda i: (0, 0)),
        out_shape=jax.ShapeDtypeStruct((1, op), jnp.float32),
        scratch_shapes=[pltpu.VMEM((n, hp), jnp.float32)],          # resident X
        compiler_params=pltpu.CompilerParams(
            dimension_semantics=("arbitrary",)),
    )(a_bf16, deg, w1p, b1p, wsp, bsp, l1wp, l1bp, l2wp, l2bp)
    return out[:, :1]  # (1, 1): only lane 0 of the lane-dense output is real


# ------------------------- Glue (plain JAX) -------------------------

def build_normalized_adjacency(edge_index, num_nodes):
    """Dense GCN normalization: D^-1/2 (A + I) D^-1/2."""
    a = jnp.zeros((num_nodes, num_nodes), jnp.float32)
    a = a.at[edge_index[0], edge_index[1]].set(1.0)
    a_hat = a + jnp.eye(num_nodes, dtype=jnp.float32)  # add self loops
    deg = jnp.sum(a_hat, axis=1)
    d_inv_sqrt = jnp.where(deg > 0, 1.0 / jnp.sqrt(deg), 0.0)
    return d_inv_sqrt[:, None] * a_hat * d_inv_sqrt[None, :]


def init_params(key, num_layers, hidden):
    def glorot(k, shape):
        fan_in, fan_out = shape
        lim = jnp.sqrt(6.0 / (fan_in + fan_out))
        return jax.random.uniform(k, shape, jnp.float32, -lim, lim)

    keys = jax.random.split(key, 2 * (num_layers + 2))
    params = {}
    params["conv1_w"] = glorot(keys[0], (1, hidden))
    params["conv1_b"] = jnp.zeros((hidden,), jnp.float32)
    params["convs_w"] = [glorot(keys[1 + i], (hidden, hidden)) for i in range(num_layers - 1)]
    params["convs_b"] = [jnp.zeros((hidden,), jnp.float32) for _ in range(num_layers - 1)]
    params["lin1_w"] = glorot(keys[num_layers], (hidden, hidden))
    params["lin1_b"] = jax.random.uniform(keys[num_layers + 1], (hidden,), jnp.float32, -0.1, 0.1)
    params["lin2_w"] = glorot(keys[num_layers + 2], (hidden, 1))
    params["lin2_b"] = jax.random.uniform(keys[num_layers + 3], (1,), jnp.float32, -0.1, 0.1)
    return params


def _pad2(x, rows, cols):
    out = jnp.zeros((rows, cols), x.dtype)
    return out.at[: x.shape[0], : x.shape[1]].set(x)


def prepare_fused_inputs(edge_index, num_nodes, params, hidden):
    """Pad feature axis to 128 lanes, cast MXU operands to bf16, stack layers."""
    hp = ((hidden + 127) // 128) * 128  # lane-dense feature width
    op = 128                            # lane-dense final output width

    a_norm = build_normalized_adjacency(edge_index, num_nodes)
    deg = jnp.sum(a_norm, axis=1, keepdims=True)   # rowsum(A_norm), f32, (N, 1)
    a_bf16 = a_norm.astype(jnp.bfloat16)

    w1p = _pad2(params["conv1_w"], 1, hp)                       # VPU operand: keep f32
    b1p = _pad2(params["conv1_b"].reshape(1, -1), 1, hp)
    wsp = jnp.stack([_pad2(w, hp, hp) for w in params["convs_w"]]).astype(jnp.bfloat16)
    bsp = jnp.stack([_pad2(b.reshape(1, -1), 1, hp) for b in params["convs_b"]])
    l1wp = _pad2(params["lin1_w"], hp, hp).astype(jnp.bfloat16)
    l1bp = _pad2(params["lin1_b"].reshape(1, -1), 1, hp)
    l2wp = _pad2(params["lin2_w"], hp, op).astype(jnp.bfloat16)  # only column 0 nonzero
    l2bp = _pad2(params["lin2_b"].reshape(1, -1), 1, op)
    return (a_bf16, deg, w1p, b1p, wsp, bsp, l1wp, l1bp, l2wp, l2bp)


def basic_gcn_forward(edge_index, num_nodes, params, hidden):
    inputs = prepare_fused_inputs(edge_index, num_nodes, params, hidden)
    return fused_basic_gcn(*inputs)


def reference_forward(edge_index, num_nodes, params):
    """Plain-JAX f32 reference of the eval-mode BasicGCN forward."""
    a = build_normalized_adjacency(edge_index, num_nodes)
    x = jnp.ones((num_nodes, 1), jnp.float32)
    x = a @ (x @ params["conv1_w"]) + params["conv1_b"][None, :]
    for w, b in zip(params["convs_w"], params["convs_b"]):
        x = a @ (x @ w) + b[None, :]
    pooled = jnp.sum(x, axis=0, keepdims=True)
    h = jnp.maximum(pooled @ params["lin1_w"] + params["lin1_b"][None, :], 0.0)
    return h @ params["lin2_w"] + params["lin2_b"][None, :]


# ------------------------- Main -------------------------

if __name__ == "__main__":
    num_nodes = 16
    hidden = 32
    num_layers = 3
    assert num_layers >= 2  # fused kernel stacks the (num_layers - 1) extra convs

    key = jax.random.PRNGKey(0)
    k_params, _ = jax.random.split(key)

    # Deterministic small graph: undirected ring on 16 nodes (edges both ways).
    src = jnp.arange(num_nodes, dtype=jnp.int32)
    dst = (src + 1) % num_nodes
    edge_index = jnp.stack(
        [jnp.concatenate([src, dst]), jnp.concatenate([dst, src])], axis=0
    )  # shape (2, 2*N)

    params = init_params(k_params, num_layers, hidden)

    out = basic_gcn_forward(edge_index, num_nodes, params, hidden)
    out = jax.block_until_ready(out)
    assert out.shape == (1, 1), out.shape

    # Sanity check against plain-JAX f32 reference (bf16 MXU operands -> loose tol).
    ref = reference_forward(edge_index, num_nodes, params)
    assert jnp.allclose(out, ref, rtol=1e-1, atol=2e-1), (out, ref)

    print("KERNEL_OK")
</pallas_src>

<mosaic_0001>
module attributes {stable_mosaic.version = 11 : i64} {
  func.func @_fused_gcn_kernel(%arg0: i32, %arg1: memref<16x16xbf16, #tpu.memory_space<vmem>>, %arg2: memref<16x1xf32, #tpu.memory_space<vmem>>, %arg3: memref<1x128xf32, #tpu.memory_space<vmem>>, %arg4: memref<1x128xf32, #tpu.memory_space<vmem>>, %arg5: memref<2x128x128xbf16, #tpu.memory_space<vmem>>, %arg6: memref<2x1x128xf32, #tpu.memory_space<vmem>>, %arg7: memref<128x128xbf16, #tpu.memory_space<vmem>>, %arg8: memref<1x128xf32, #tpu.memory_space<vmem>>, %arg9: memref<128x128xbf16, #tpu.memory_space<vmem>>, %arg10: memref<1x128xf32, #tpu.memory_space<vmem>>, %arg11: memref<1x128xf32, #tpu.memory_space<vmem>>, %arg12: memref<16x128xf32, #tpu.memory_space<vmem>>) attributes {dimension_semantics = [#tpu.dimension_semantics<arbitrary>], iteration_bounds = array<i64: 1>, scalar_prefetch = 0 : i64, scratch_operands = 1 : i64, tpu.core_type = #tpu.core_type<tc>, window_params = [{pipeline_mode = #tpu.pipeline_mode<synchronous>, transform_indices = @transform_0, window_bounds = array<i64: 16, 16>}, {pipeline_mode = #tpu.pipeline_mode<synchronous>, transform_indices = @transform_1, window_bounds = array<i64: 16, 1>}, {pipeline_mode = #tpu.pipeline_mode<synchronous>, transform_indices = @transform_2, window_bounds = array<i64: 1, 128>}, {pipeline_mode = #tpu.pipeline_mode<synchronous>, transform_indices = @transform_3, window_bounds = array<i64: 1, 128>}, {pipeline_mode = #tpu.pipeline_mode<synchronous>, transform_indices = @transform_4, window_bounds = array<i64: 2, 128, 128>}, {pipeline_mode = #tpu.pipeline_mode<synchronous>, transform_indices = @transform_5, window_bounds = array<i64: 2, 1, 128>}, {pipeline_mode = #tpu.pipeline_mode<synchronous>, transform_indices = @transform_6, window_bounds = array<i64: 128, 128>}, {pipeline_mode = #tpu.pipeline_mode<synchronous>, transform_indices = @transform_7, window_bounds = array<i64: 1, 128>}, {pipeline_mode = #tpu.pipeline_mode<synchronous>, transform_indices = @transform_8, window_bounds = array<i64: 128, 128>}, {pipeline_mode = #tpu.pipeline_mode<synchronous>, transform_indices = @transform_9, window_bounds = array<i64: 1, 128>}, {pipeline_mode = #tpu.pipeline_mode<synchronous>, transform_indices = @transform_10, window_bounds = array<i64: 1, 128>}]} {
    %c0 = arith.constant 0 : index
    %c0_0 = arith.constant 0 : index
    %0 = vector.load %arg2[%c0, %c0_0] : memref<16x1xf32, #tpu.memory_space<vmem>>, vector<16x1xf32>
    %c0_1 = arith.constant 0 : index
    %c0_2 = arith.constant 0 : index
    %1 = vector.load %arg3[%c0_1, %c0_2] : memref<1x128xf32, #tpu.memory_space<vmem>>, vector<1x128xf32>
    %2 = vector.broadcast %0 : vector<16x1xf32> to vector<16x128xf32>
    %3 = vector.broadcast %1 : vector<1x128xf32> to vector<16x128xf32>
    %4 = arith.mulf %2, %3 : vector<16x128xf32>
    %c0_3 = arith.constant 0 : index
    %c0_4 = arith.constant 0 : index
    %5 = vector.load %arg4[%c0_3, %c0_4] : memref<1x128xf32, #tpu.memory_space<vmem>>, vector<1x128xf32>
    %6 = vector.broadcast %5 : vector<1x128xf32> to vector<16x128xf32>
    %7 = arith.addf %4, %6 : vector<16x128xf32>
    %c0_5 = arith.constant 0 : index
    %c0_6 = arith.constant 0 : index
    %8 = vector.load %arg12[%c0_5, %c0_6] : memref<16x128xf32, #tpu.memory_space<vmem>>, vector<16x128xf32>
    tpu.vector_store %arg12[%c0_5, %c0_6], %7 {strides = array<i32>} : memref<16x128xf32, #tpu.memory_space<vmem>>, vector<16x128xf32>,
    %c0_7 = arith.constant 0 : index
    %c0_8 = arith.constant 0 : index
    %9 = vector.load %arg1[%c0_7, %c0_8] : memref<16x16xbf16, #tpu.memory_space<vmem>>, vector<16x16xbf16>
    %c0_9 = arith.constant 0 : index
    %c0_10 = arith.constant 0 : index
    %10 = vector.load %arg12[%c0_9, %c0_10] : memref<16x128xf32, #tpu.memory_space<vmem>>, vector<16x128xf32>
    %11 = arith.truncf %10 : vector<16x128xf32> to vector<16x128xbf16>
    %c0_11 = arith.constant 0 : index
    %c0_12 = arith.constant 0 : index
    %c0_13 = arith.constant 0 : index
    %12 = vector.load %arg5[%c0_11, %c0_12, %c0_13] : memref<2x128x128xbf16, #tpu.memory_space<vmem>>, vector<1x128x128xbf16>
    %13 = vector.shape_cast %12 : vector<1x128x128xbf16> to vector<128x128xbf16>
    %cst = arith.constant dense<0.000000e+00> : vector<16x128xf32>
    %14 = tpu.matmul %11, %13, %cst {dimension_numbers = #tpu.dot_dimension_numbers<[1], [0], [0], [1], [0, 0, 1, 1], [], []>} : vector<16x128xbf16>, vector<128x128xbf16>, vector<16x128xf32> -> vector<16x128xf32>
    %15 = arith.truncf %14 : vector<16x128xf32> to vector<16x128xbf16>
    %cst_14 = arith.constant dense<0.000000e+00> : vector<16x128xf32>
    %16 = tpu.matmul %9, %15, %cst_14 {dimension_numbers = #tpu.dot_dimension_numbers<[1], [0], [0], [1], [0, 0, 1, 1], [], []>} : vector<16x16xbf16>, vector<16x128xbf16>, vector<16x128xf32> -> vector<16x128xf32>
    %c0_15 = arith.constant 0 : index
    %c0_16 = arith.constant 0 : index
    %c0_17 = arith.constant 0 : index
    %17 = vector.load %arg6[%c0_15, %c0_16, %c0_17] : memref<2x1x128xf32, #tpu.memory_space<vmem>>, vector<1x1x128xf32>
    %18 = vector.shape_cast %17 : vector<1x1x128xf32> to vector<1x128xf32>
    %19 = vector.broadcast %18 : vector<1x128xf32> to vector<16x128xf32>
    %20 = arith.addf %16, %19 : vector<16x128xf32>
    %c0_18 = arith.constant 0 : index
    %c0_19 = arith.constant 0 : index
    %21 = vector.load %arg12[%c0_18, %c0_19] : memref<16x128xf32, #tpu.memory_space<vmem>>, vector<16x128xf32>
    tpu.vector_store %arg12[%c0_18, %c0_19], %20 {strides = array<i32>} : memref<16x128xf32, #tpu.memory_space<vmem>>, vector<16x128xf32>,
    %c0_20 = arith.constant 0 : index
    %c0_21 = arith.constant 0 : index
    %22 = vector.load %arg12[%c0_20, %c0_21] : memref<16x128xf32, #tpu.memory_space<vmem>>, vector<16x128xf32>
    %23 = arith.truncf %22 : vector<16x128xf32> to vector<16x128xbf16>
    %c1 = arith.constant 1 : index
    %c0_22 = arith.constant 0 : index
    %c0_23 = arith.constant 0 : index
    %24 = vector.load %arg5[%c1, %c0_22, %c0_23] : memref<2x128x128xbf16, #tpu.memory_space<vmem>>, vector<1x128x128xbf16>
    %25 = vector.shape_cast %24 : vector<1x128x128xbf16> to vector<128x128xbf16>
    %cst_24 = arith.constant dense<0.000000e+00> : vector<16x128xf32>
    %26 = tpu.matmul %23, %25, %cst_24 {dimension_numbers = #tpu.dot_dimension_numbers<[1], [0], [0], [1], [0, 0, 1, 1], [], []>} : vector<16x128xbf16>, vector<128x128xbf16>, vector<16x128xf32> -> vector<16x128xf32>
    %27 = arith.truncf %26 : vector<16x128xf32> to vector<16x128xbf16>
    %cst_25 = arith.constant dense<0.000000e+00> : vector<16x128xf32>
    %28 = tpu.matmul %9, %27, %cst_25 {dimension_numbers = #tpu.dot_dimension_numbers<[1], [0], [0], [1], [0, 0, 1, 1], [], []>} : vector<16x16xbf16>, vector<16x128xbf16>, vector<16x128xf32> -> vector<16x128xf32>
    %c1_26 = arith.constant 1 : index
    %c0_27 = arith.constant 0 : index
    %c0_28 = arith.constant 0 : index
    %29 = vector.load %arg6[%c1_26, %c0_27, %c0_28] : memref<2x1x128xf32, #tpu.memory_space<vmem>>, vector<1x1x128xf32>
    %30 = vector.shape_cast %29 : vector<1x1x128xf32> to vector<1x128xf32>
    %31 = vector.broadcast %30 : vector<1x128xf32> to vector<16x128xf32>
    %32 = arith.addf %28, %31 : vector<16x128xf32>
    %c0_29 = arith.constant 0 : index
    %c0_30 = arith.constant 0 : index
    %33 = vector.load %arg12[%c0_29, %c0_30] : memref<16x128xf32, #tpu.memory_space<vmem>>, vector<16x128xf32>
    tpu.vector_store %arg12[%c0_29, %c0_30], %32 {strides = array<i32>} : memref<16x128xf32, #tpu.memory_space<vmem>>, vector<16x128xf32>,
    %c0_31 = arith.constant 0 : index
    %c0_32 = arith.constant 0 : index
    %34 = vector.load %arg12[%c0_31, %c0_32] : memref<16x128xf32, #tpu.memory_space<vmem>>, vector<16x128xf32>
    %cst_33 = arith.constant dense<0.000000e+00> : vector<128xf32>
    %35 = vector.multi_reduction <add>, %34, %cst_33 [0] : vector<16x128xf32> to vector<128xf32>
    %36 = vector.shape_cast %35 : vector<128xf32> to vector<1x128xf32>
    %37 = arith.truncf %36 : vector<1x128xf32> to vector<1x128xbf16>
    %c0_34 = arith.constant 0 : index
    %c0_35 = arith.constant 0 : index
    %38 = vector.load %arg7[%c0_34, %c0_35] : memref<128x128xbf16, #tpu.memory_space<vmem>>, vector<128x128xbf16>
    %cst_36 = arith.constant dense<0.000000e+00> : vector<1x128xf32>
    %39 = tpu.matmul %37, %38, %cst_36 {dimension_numbers = #tpu.dot_dimension_numbers<[1], [0], [0], [1], [0, 0, 1, 1], [], []>} : vector<1x128xbf16>, vector<128x128xbf16>, vector<1x128xf32> -> vector<1x128xf32>
    %c0_37 = arith.constant 0 : index
    %c0_38 = arith.constant 0 : index
    %40 = vector.load %arg8[%c0_37, %c0_38] : memref<1x128xf32, #tpu.memory_space<vmem>>, vector<1x128xf32>
    %41 = arith.addf %39, %40 : vector<1x128xf32>
    %cst_39 = arith.constant 0.000000e+00 : f32
    %42 = vector.broadcast %cst_39 : f32 to vector<1x128xf32>
    %43 = arith.maximumf %41, %42 : vector<1x128xf32>
    %44 = arith.truncf %43 : vector<1x128xf32> to vector<1x128xbf16>
    %c0_40 = arith.constant 0 : index
    %c0_41 = arith.constant 0 : index
    %45 = vector.load %arg9[%c0_40, %c0_41] : memref<128x128xbf16, #tpu.memory_space<vmem>>, vector<128x128xbf16>
    %cst_42 = arith.constant dense<0.000000e+00> : vector<1x128xf32>
    %46 = tpu.matmul %44, %45, %cst_42 {dimension_numbers = #tpu.dot_dimension_numbers<[1], [0], [0], [1], [0, 0, 1, 1], [], []>} : vector<1x128xbf16>, vector<128x128xbf16>, vector<1x128xf32> -> vector<1x128xf32>
    %c0_43 = arith.constant 0 : index
    %c0_44 = arith.constant 0 : index
    %47 = vector.load %arg10[%c0_43, %c0_44] : memref<1x128xf32, #tpu.memory_space<vmem>>, vector<1x128xf32>
    %48 = arith.addf %46, %47 : vector<1x128xf32>
    %c0_45 = arith.constant 0 : index
    %c0_46 = arith.constant 0 : index
    %49 = vector.load %arg11[%c0_45, %c0_46] : memref<1x128xf32, #tpu.memory_space<vmem>>, vector<1x128xf32>
    tpu.vector_store %arg11[%c0_45, %c0_46], %48 {strides = array<i32>} : memref<1x128xf32, #tpu.memory_space<vmem>>, vector<1x128xf32>,
    return
  }
  func.func @transform_0(%arg0: i32) -> (i32, i32) {
    %c0_i32 = arith.constant 0 : i32
    %c0_i32_0 = arith.constant 0 : i32
    %c0_i32_1 = arith.constant 0 : i32
    return %c0_i32, %c0_i32_0 : i32, i32
  }
  func.func @transform_1(%arg0: i32) -> (i32, i32) {
    %c0_i32 = arith.constant 0 : i32
    %c0_i32_0 = arith.constant 0 : i32
    %c0_i32_1 = arith.constant 0 : i32
    return %c0_i32, %c0_i32_0 : i32, i32
  }
  func.func @transform_2(%arg0: i32) -> (i32, i32) {
    %c0_i32 = arith.constant 0 : i32
    %c0_i32_0 = arith.constant 0 : i32
    %c0_i32_1 = arith.constant 0 : i32
    return %c0_i32, %c0_i32_0 : i32, i32
  }
  func.func @transform_3(%arg0: i32) -> (i32, i32) {
    %c0_i32 = arith.constant 0 : i32
    %c0_i32_0 = arith.constant 0 : i32
    %c0_i32_1 = arith.constant 0 : i32
    return %c0_i32, %c0_i32_0 : i32, i32
  }
  func.func @transform_4(%arg0: i32) -> (i32, i32, i32) {
    %c0_i32 = arith.constant 0 : i32
    %c0_i32_0 = arith.constant 0 : i32
    %c0_i32_1 = arith.constant 0 : i32
    %c0_i32_2 = arith.constant 0 : i32
    return %c0_i32, %c0_i32_0, %c0_i32_1 : i32, i32, i32
  }
  func.func @transform_5(%arg0: i32) -> (i32, i32, i32) {
    %c0_i32 = arith.constant 0 : i32
    %c0_i32_0 = arith.constant 0 : i32
    %c0_i32_1 = arith.constant 0 : i32
    %c0_i32_2 = arith.constant 0 : i32
    return %c0_i32, %c0_i32_0, %c0_i32_1 : i32, i32, i32
  }
  func.func @transform_6(%arg0: i32) -> (i32, i32) {
    %c0_i32 = arith.constant 0 : i32
    %c0_i32_0 = arith.constant 0 : i32
    %c0_i32_1 = arith.constant 0 : i32
    return %c0_i32, %c0_i32_0 : i32, i32
  }
  func.func @transform_7(%arg0: i32) -> (i32, i32) {
    %c0_i32 = arith.constant 0 : i32
    %c0_i32_0 = arith.constant 0 : i32
    %c0_i32_1 = arith.constant 0 : i32
    return %c0_i32, %c0_i32_0 : i32, i32
  }
  func.func @transform_8(%arg0: i32) -> (i32, i32) {
    %c0_i32 = arith.constant 0 : i32
    %c0_i32_0 = arith.constant 0 : i32
    %c0_i32_1 = arith.constant 0 : i32
    return %c0_i32, %c0_i32_0 : i32, i32
  }
  func.func @transform_9(%arg0: i32) -> (i32, i32) {
    %c0_i32 = arith.constant 0 : i32
    %c0_i32_0 = arith.constant 0 : i32
    %c0_i32_1 = arith.constant 0 : i32
    return %c0_i32, %c0_i32_0 : i32, i32
  }
  func.func @transform_10(%arg0: i32) -> (i32, i32) {
    %c0_i32 = arith.constant 0 : i32
    %c0_i32_0 = arith.constant 0 : i32
    %c0_i32_1 = arith.constant 0 : i32
    return %c0_i32, %c0_i32_0 : i32, i32
  }
}

</mosaic_0001>

<bundles_post_ra>
// kernel: tpu_custom_call.1
= control target key start
LH: loop header
LB: loop body
LE: loop exit
PB: predicated region body
PF: predicated region fallthrough
CT: control target
= control target key end

     0   :  { %15 = vsyncpa [#allocation4], 0  ;;  %s1132_s0 = inlined_call_operand.vmem [shape: bf16[16,16], index: 0, kind: input, shape index: {}]   ;;  %s1133_s1 = inlined_call_operand.vmem [shape: f32[16,1], index: 1, kind: input, shape index: {}]   ;;  %s1134_s2 = inlined_call_operand.vmem [shape: f32[1,128], index: 2, kind: input, shape index: {}]   ;;  %s1135_s3 = inlined_call_operand.vmem [shape: f32[1,128], index: 3, kind: input, shape index: {}]   ;;  %s1136_s4 = inlined_call_operand.hbm [shape: bf16[2,128,128], index: 4, kind: input, shape index: {}]   ;;  %s1137_s5 = inlined_call_operand.vmem [shape: f32[2,1,128], index: 5, kind: input, shape index: {}]   ;;  %s1138_s6 = inlined_call_operand.hbm [shape: bf16[128,128], index: 6, kind: input, shape index: {}]   ;;  %s1139_s7 = inlined_call_operand.vmem [shape: f32[1,128], index: 7, kind: input, shape index: {}]   ;;  %s1140_s8 = inlined_call_operand.hbm [shape: bf16[128,128], index: 8, kind: input, shape index: {}]   ;;  %s1141_s9 = inlined_call_operand.vmem [shape: f32[1,128], index: 9, kind: input, shape index: {}]   ;;  %s1142_s10 = inlined_call_operand.hbm [shape: f32[1,128], index: 10, kind: output, shape index: {}]  }
   0x1   :  { %16 = vsyncpa [#allocation7], 0 }
   0x2   :  { %17 = vsyncpa [#allocation5], 0  ;;  %s981_s13 = smov [#allocation6]   ;;  %s982_s15 = smov [#allocation3]  }
   0x3   :  { %s45_s14 = sshll.u32 %s981_s13, 4  ;;  %s31_s16 = sshll.u32 %s982_s15, 4  ;;  %s46_s14 = int_to_ptr.vmem [resolvable:$true] %s45_s14  ;;  %s32_s16 = int_to_ptr.vmem [resolvable:$true] %s31_s16 }
   0x4   :  { %s903_s17 = scalar_lea.vmem %s46_s14, 1024  ;;  %p908_p1 = scmp.lt.s32.totalorder %s46_s14, %s46_s14 }
   0x5   :  { %p904_p0 = scmp.ne.s32.totalorder %s46_s14, %s903_s17  ;;  %p909_p2 = scmp.lt.s32.totalorder %s903_s17, %s903_s17 }
   0x7   :  { %p910_p3 = por %p909_p2, %p908_p1 }
   0x9   :  { %p911_p4 = pnand %p910_p3, %p904_p0 }
   0xb   :  { %914 = shalt.err (!%p911_p4)
}
   0xc   :  { %s983_s18 = smov 64   ;;  %s984_s19 = smov 4  }
   0xd   :  { %51 = dma.hbm_to_vmem [thread:$0]  %s1138_s6, 1024, %s46_s14, [#allocation7], %s983_s18, %s983_s18, %s984_s19  }
   0xe   :  { %s923_s22 = scalar_lea.vmem %s32_s16, 2048  ;;  %p928_p6 = scmp.lt.s32.totalorder %s32_s16, %s32_s16 }
   0xf   :  { %p924_p5 = scmp.ne.s32.totalorder %s32_s16, %s923_s22  ;;  %p929_p7 = scmp.lt.s32.totalorder %s923_s22, %s923_s22 }
  0x11   :  { %p930_p8 = por %p929_p7, %p928_p6 }
  0x13   :  { %p931_p9 = pnand %p930_p8, %p924_p5 }
  0x15   :  { %934 = shalt.err (!%p931_p9)
}
  0x16   :  { %37 = dma.hbm_to_vmem [thread:$0]  %s1136_s4, 2048, %s32_s16, [#allocation4], %s983_s18, %s983_s18, %s984_s19  }
  0x17   :  { %s985_s25 = smov [#allocation8]  }
  0x18   :  { %s59_s26 = sshll.u32 %s985_s25, 4  ;;  %s60_s26 = int_to_ptr.vmem [resolvable:$true] %s59_s26 }
  0x19   :  { %s943_s27 = scalar_lea.vmem %s60_s26, 1024  ;;  %p948_p11 = scmp.lt.s32.totalorder %s60_s26, %s60_s26 }
  0x1a   :  { %p944_p10 = scmp.ne.s32.totalorder %s60_s26, %s943_s27  ;;  %p949_p12 = scmp.lt.s32.totalorder %s943_s27, %s943_s27 }
  0x1c   :  { %p950_p13 = por %p949_p12, %p948_p11 }
  0x1e   :  { %p951_p0 = pnand %p950_p13, %p944_p10 }
  0x20   :  { %954 = shalt.err (!%p951_p0)
}
  0x21   :  { %65 = dma.hbm_to_vmem [thread:$0]  %s1140_s8, 1024, %s60_s26, [#allocation7], %s983_s18, %s983_s18, %s984_s19  }
  0x22   :  { %975 = dma.done.wait [#allocation4], 2048  }
  0x23   :  { %976 = vsyncadd [#allocation4], 4294965248 }
  0x24   :  { %977 = dma.done.wait [#allocation7], 2048  }
  0x25   :  { %978 = vsyncadd [#allocation7], 4294965248  ;;  %v986_v0 = vmov 0   ;;  %v987_v1 = vmov 0.0   ;;  %v78_v2 = vld [vmem:[%s1133_s1] sm:$0xff]  ;;  %v862_v3 = vld [vmem:[#allocation3 + $0x38] sm:$0xff]  }
  0x26   :  { %861 = vset.pattern.permute.xlu0 %v986_v0  ;;  %760 = vmatprep.subr.bf16.mxu0 %v987_v1  ;;  %v79_v4 = vld [vmem:[%s1133_s1 + $0x8] sm:$0xff]  ;;  %v863_v5 = vld [vmem:[#allocation3 + $0x30] sm:$0xff]   ;;  %vm988_vm0 = vmmov 0   ;;  %v865_v7 = vld [vmem:[#allocation3 + $0x20] sm:$0xff]   ;;  %vm233_vm1 = vcmask 130048   ;;  %s989_s20 = smov [#allocation9]  }
  0x27   :  { %780 = vmatprep.subr.bf16.mxu1 %v987_v1  ;;  %83 = vperm.xlu0 %861, %v78_v2   ;;  %v864_v6 = vld [vmem:[#allocation3 + $0x28] sm:$0xff]   ;;  %v866_v8 = vld [vmem:[#allocation3 + $0x18] sm:$0xff]   ;;  %v867_v9 = vld [vmem:[#allocation3 + $0x10] sm:$0xff]   ;;  %s670_s21 = sshll.u32 %s989_s20, 4  ;;  %s671_s21 = int_to_ptr.vmem [resolvable:$true] %s670_s21 }
  0x28   :  { %761 = vmatpush3.bf16.msra.mxu0 %v862_v3  ;;  %776 = vmatprep.mubr.msk.bf16.mxu0 %vm988_vm0, %v987_v1  ;;  %v868_v10 = vld [vmem:[#allocation3 + $0x8] sm:$0xff]   ;;  %v869_v11 = vld [vmem:[#allocation3] sm:$0xff]   ;;  %v871_v27 = vld [vmem:[#allocation3 + $0x78] sm:$0xff]   ;;  %s959_s22 = scalar_lea.vmem %s671_s21, 32  ;;  %p960_p2 = scmp.lt.s32.totalorder %s671_s21, %s671_s21 }
  0x29   :  { %762 = vmatprep.subr.bf16.mxu0 %v987_v1  ;;  %782 = vmatprep.mubr.msk.bf16.mxu1 %vm988_vm0, %v987_v1  ;;  %v680_v12 = vld [vmem:[%s1134_s2] ss:$0 sm:$0xff]  ;;  %v872_v28 = vld [vmem:[#allocation3 + $0x70] sm:$0xff]   ;;  %v873_v29 = vld [vmem:[#allocation3 + $0x68] sm:$0xff]  }
  0x2a   :  { %v681_v15 = vld [vmem:[%s1135_s3] ss:$0 sm:$0xff]  ;;  %v875_v31 = vld [vmem:[#allocation3 + $0x58] sm:$0xff]   ;;  %v876_v32 = vld [vmem:[#allocation3 + $0x50] sm:$0xff]  }
  0x2b   :  { %88 = vperm.xlu0 %861, %v79_v4   ;;  %v870_v26 = vld [vmem:[%s1132_s0] sm:$0xff]   ;;  %v877_v33 = vld [vmem:[#allocation3 + $0x48] sm:$0xff]   ;;  %v879_v43 = vld [vmem:[#allocation6 + $0x38] sm:$0xff]  }
  0x2c   :  { %763 = vmatpush3.bf16.msra.mxu0 %v863_v5  ;;  %v874_v30 = vld [vmem:[#allocation3 + $0x60] sm:$0xff]   ;;  %v880_v44 = vld [vmem:[#allocation6 + $0x30] sm:$0xff]   ;;  %v881_v50 = vld [vmem:[#allocation6 + $0x28] sm:$0xff]  }
  0x2d   :  { %764 = vmatprep.subr.bf16.mxu0 %v987_v1  ;;  %v878_v34 = vld [vmem:[#allocation3 + $0x40] sm:$0xff]   ;;  %v883_v52 = vld [vmem:[#allocation6 + $0x18] sm:$0xff]   ;;  %v884_v53 = vld [vmem:[#allocation6 + $0x10] sm:$0xff]  }
  0x2e   :  { %v690_v36 = vld [vmem:[%s1137_s5] ss:$0 sm:$0xff]  ;;  %v885_v54 = vld [vmem:[#allocation6 + $0x8] sm:$0xff]   ;;  %v887_v56 = vld [vmem:[#allocation8 + $0x38] sm:$0xff]  }
  0x2f   :  { %v882_v51 = vld [vmem:[#allocation6 + $0x20] sm:$0xff]   ;;  %v888_v57 = vld [vmem:[#allocation8 + $0x30] sm:$0xff]   ;;  %v889_v58 = vld [vmem:[#allocation8 + $0x28] sm:$0xff]  }
  0x30   :  { %765 = vmatpush3.bf16.msra.mxu0 %v864_v6  ;;  %v886_v55 = vld [vmem:[#allocation6] sm:$0xff]   ;;  %v891_v60 = vld [vmem:[#allocation8 + $0x18] sm:$0xff]   ;;  %v892_v61 = vld [vmem:[#allocation8 + $0x10] sm:$0xff]  }
  0x31   :  { %766 = vmatprep.subr.bf16.mxu0 %v987_v1  ;;  %v890_v59 = vld [vmem:[#allocation8 + $0x20] sm:$0xff]  }
  0x32   :  { %v702_v63 = vld [vmem:[%s1137_s5 + $0x1] ss:$0 sm:$0xff] }
  0x34   :  { %767 = vmatpush3.bf16.msra.mxu0 %v865_v7 }
  0x35   :  { %768 = vmatprep.subr.bf16.mxu0 %v987_v1 }
  0x38   :  { %769 = vmatpush3.bf16.msra.mxu0 %v866_v8 }
  0x39   :  { %770 = vmatprep.subr.bf16.mxu0 %v987_v1 }
  0x3c   :  { %771 = vmatpush3.bf16.msra.mxu0 %v867_v9 }
  0x3d   :  { %772 = vmatprep.subr.bf16.mxu0 %v987_v1 }
  0x40   :  { %773 = vmatpush3.bf16.msra.mxu0 %v868_v10 }
  0x41   :  { %774 = vmatprep.subr.bf16.mxu0 %v987_v1 }
  0x44   :  { %775 = vmatpush3.bf16.msra.mxu0 %v869_v11 }
  0x45   :  { %806 = vmatprep.subr.bf16.mxu0 %v987_v1 }
  0xa2   :  { %v84_v13 = vpop.permute.xlu0 %83 }
  0xa3   :  { %v97_v14 = vmul.f32 %v680_v12, %v84_v13 }
  0xa5   :  { %v106_v18 = vadd.f32 %v681_v15, %v97_v14  ;;  %v893_v14 = vld [vmem:[#allocation8 + $0x8] sm:$0xff]  }
  0xa6   :  { %v89_v16 = vpop.permute.xlu0 %88 }
  0xa7   :  { %v98_v17 = vmul.f32 %v680_v12, %v89_v16  ;;  %v467_v16 = vld [vmem:[%s1139_s7] sm:$0x1]  ;;  %s955_s7 = scalar_lea.vmem %s671_s21, 16 }
  0xa8   :  { %p956_p1 = scmp.ne.s32.totalorder %s671_s21, %s955_s7  ;;  %p961_p3 = scmp.lt.s32.totalorder %s959_s22, %s955_s7 }
  0xa9   :  { %v107_v19 = vadd.f32 %v681_v15, %v98_v17  ;;  %v894_v15 = vld [vmem:[#allocation8] sm:$0xff]  }
  0xaa   :  { %p962_p4 = por %p961_p3, %p960_p2 }
  0xab   :  { %v114_v20 = vpack.c.bf16 %v107_v19, %v106_v18 }
  0xac   :  { %p963_p5 = pnand %p962_p4, %p956_p1 }
  0xad   :  { %777 = vmatmul.mubr.bf16.vlgmr.msra.gmra.mxu0 %v114_v20 }
  0xae   :  { %808 = vmatprep.mubr.msk.bf16.mxu0 %vm988_vm0, %v987_v1 }
 0x16d   :  { %v213_v21 = vpop.f32.mrf.mxu0 }
 0x16f   :  { %v778_v22 = vpop.f32.mrf.mxu0 }
 0x171   :  { %v216_v23 = vpop.f32.mrf.mxu0 }
 0x172   :  { %v220_v24 = vpack.c.bf16 %v216_v23, %v213_v21 }
 0x173   :  { %v779_v25 = vpop.f32.mrf.mxu0 }
 0x174   :  { %781 = vmatpush3.bf16.msra.mxu1 %v220_v24  ;;  %v574_v24 = vld [vmem:[%s1141_s9] sm:$0x1] }
 0x175   :  { %786 = vmatprep.subr.bf16.mxu1 %v987_v1 }
 0x177   :  { %783 = vmatmul.mubr.msk.bf16.vlgmr.msra.gmra.mxu1 %vm233_vm1, %v870_v26 }
 0x178   :  { %787 = vmatpush3.bf16.msra.mxu1 %v871_v27  ;;  %802 = vmatprep.mubr.msk.bf16.mxu1 %vm988_vm0, %v987_v1 }
 0x179   :  { %788 = vmatprep.subr.bf16.mxu1 %v987_v1 }
 0x17c   :  { %789 = vmatpush3.bf16.msra.mxu1 %v872_v28 }
 0x17d   :  { %790 = vmatprep.subr.bf16.mxu1 %v987_v1 }
 0x180   :  { %791 = vmatpush3.bf16.msra.mxu1 %v873_v29 }
 0x181   :  { %792 = vmatprep.subr.bf16.mxu1 %v987_v1 }
 0x184   :  { %793 = vmatpush3.bf16.msra.mxu1 %v874_v30 }
 0x185   :  { %794 = vmatprep.subr.bf16.mxu1 %v987_v1 }
 0x188   :  { %795 = vmatpush3.bf16.msra.mxu1 %v875_v31 }
 0x189   :  { %796 = vmatprep.subr.bf16.mxu1 %v987_v1 }
 0x18c   :  { %797 = vmatpush3.bf16.msra.mxu1 %v876_v32 }
 0x18d   :  { %798 = vmatprep.subr.bf16.mxu1 %v987_v1 }
 0x190   :  { %799 = vmatpush3.bf16.msra.mxu1 %v877_v33 }
 0x191   :  { %800 = vmatprep.subr.bf16.mxu1 %v987_v1 }
 0x194   :  { %801 = vmatpush3.bf16.msra.mxu1 %v878_v34 }
 0x195   :  { %812 = vmatprep.subr.bf16.mxu1 %v987_v1 }
 0x237   :  { %v271_v35 = vpop.f32.mrf.mxu1 }
 0x238   :  { %v272_v39 = vadd.f32 %v690_v36, %v271_v35 }
 0x239   :  { %v784_v37 = vpop.f32.mrf.mxu1 }
 0x23b   :  { %v274_v38 = vpop.f32.mrf.mxu1 }
 0x23c   :  { %v275_v40 = vadd.f32 %v690_v36, %v274_v38 }
 0x23d   :  { %v785_v41 = vpop.f32.mrf.mxu1 }
 0x23e   :  { %v282_v42 = vpack.c.bf16 %v275_v40, %v272_v39 }
 0x240   :  { %803 = vmatmul.mubr.bf16.vlgmr.msra.gmra.mxu1 %v282_v42 }
 0x241   :  { %828 = vmatprep.mubr.msk.bf16.mxu1 %vm988_vm0, %v987_v1  ;;  %813 = vmatpush3.bf16.msra.mxu1 %v879_v43 }
 0x242   :  { %814 = vmatprep.subr.bf16.mxu1 %v987_v1 }
 0x245   :  { %815 = vmatpush3.bf16.msra.mxu1 %v880_v44 }
 0x246   :  { %816 = vmatprep.subr.bf16.mxu1 %v987_v1 }
 0x249   :  { %817 = vmatpush3.bf16.msra.mxu1 %v881_v50 }
 0x24a   :  { %818 = vmatprep.subr.bf16.mxu1 %v987_v1 }
 0x24d   :  { %819 = vmatpush3.bf16.msra.mxu1 %v882_v51 }
 0x24e   :  { %820 = vmatprep.subr.bf16.mxu1 %v987_v1 }
 0x251   :  { %821 = vmatpush3.bf16.msra.mxu1 %v883_v52 }
 0x252   :  { %822 = vmatprep.subr.bf16.mxu1 %v987_v1 }
 0x255   :  { %823 = vmatpush3.bf16.msra.mxu1 %v884_v53 }
 0x256   :  { %824 = vmatprep.subr.bf16.mxu1 %v987_v1 }
 0x259   :  { %825 = vmatpush3.bf16.msra.mxu1 %v885_v54 }
 0x25a   :  { %826 = vmatprep.subr.bf16.mxu1 %v987_v1 }
 0x25d   :  { %827 = vmatpush3.bf16.msra.mxu1 %v886_v55 }
 0x300   :  { %v382_v45 = vpop.f32.mrf.mxu1 }
 0x302   :  { %v804_v46 = vpop.f32.mrf.mxu1 }
 0x304   :  { %v385_v47 = vpop.f32.mrf.mxu1 }
 0x305   :  { %v389_v48 = vpack.c.bf16 %v385_v47, %v382_v45 }
 0x306   :  { %v805_v49 = vpop.f32.mrf.mxu1 }
 0x307   :  { %807 = vmatpush3.bf16.msra.mxu0 %v389_v48 }
 0x308   :  { %832 = vmatprep.subr.bf16.mxu0 %v987_v1 }
 0x30a   :  { %809 = vmatmul.mubr.msk.bf16.vlgmr.msra.gmra.mxu0 %vm233_vm1, %v870_v26 }
 0x30b   :  { %848 = vmatprep.mubr.msk.bf16.mxu0 %vm988_vm0, %v987_v1  ;;  %833 = vmatpush3.bf16.msra.mxu0 %v887_v56 }
 0x30c   :  { %834 = vmatprep.subr.bf16.mxu0 %v987_v1 }
 0x30f   :  { %835 = vmatpush3.bf16.msra.mxu0 %v888_v57 }
 0x310   :  { %836 = vmatprep.subr.bf16.mxu0 %v987_v1 }
 0x313   :  { %837 = vmatpush3.bf16.msra.mxu0 %v889_v58 }
 0x314   :  { %838 = vmatprep.subr.bf16.mxu0 %v987_v1 }
 0x317   :  { %839 = vmatpush3.bf16.msra.mxu0 %v890_v59 }
 0x318   :  { %840 = vmatprep.subr.bf16.mxu0 %v987_v1 }
 0x31b   :  { %841 = vmatpush3.bf16.msra.mxu0 %v891_v60 }
 0x31c   :  { %842 = vmatprep.subr.bf16.mxu0 %v987_v1 }
 0x31f   :  { %843 = vmatpush3.bf16.msra.mxu0 %v892_v61 }
 0x320   :  { %844 = vmatprep.subr.bf16.mxu0 %v987_v1 }
 0x323   :  { %845 = vmatpush3.bf16.msra.mxu0 %v893_v14 }
 0x324   :  { %846 = vmatprep.subr.bf16.mxu0 %v987_v1 }
 0x327   :  { %847 = vmatpush3.bf16.msra.mxu0 %v894_v15 }
 0x3ca   :  { %v432_v62 = vpop.f32.mrf.mxu0 }
 0x3cb   :  { %v433_v3 = vadd.f32 %v702_v63, %v432_v62 }
 0x3cc   :  { %v810_v0 = vpop.f32.mrf.mxu0 }
 0x3ce   :  { %v435_v2 = vpop.f32.mrf.mxu0 }
 0x3cf   :  { %v436_v4 = vadd.f32 %v702_v63, %v435_v2 }
 0x3d0   :  { %v811_v5 = vpop.f32.mrf.mxu0 }
 0x3d1   :  { %v443_v6 = vadd.f32 %v436_v4, %v433_v3 }
 0x3d3   :  { %v444_v7 = vrot.slane %v443_v6, 4 }
 0x3d5   :  { %v445_v8 = vadd.f32 %v444_v7, %v443_v6 }
 0x3d7   :  { %v446_v9 = vrot.slane %v445_v8, 2 }
 0x3d9   :  { %v447_v10 = vadd.f32 %v446_v9, %v445_v8 }
 0x3db   :  { %v448_v11 = vrot.slane %v447_v10, 1 }
 0x3dd   :  { %v449_v12 = vadd.f32 %v448_v11, %v447_v10 }
 0x3df   :  { %v450_v13 = vpack.c.bf16 %v449_v12, %v449_v12 }
 0x3e1   :  { %829 = vmatmul.mubr.bf16.vlgmr.msra.gmra.mxu1 %v450_v13 }
 0x4a1   :  { %v550_v17 = vpop.f32.mrf.mxu1 }
 0x4a2   :  { %v551_v18 = vadd.f32 %v550_v17, %v467_v16 }
 0x4a3   :  { %v830_v19 = vpop.f32.mrf.mxu1 }
 0x4a4   :  { %v556_v20 = vmax.f32 %v551_v18, 0.0 }
 0x4a5   :  { %v553_v21 = vpop.f32.mrf.mxu1 }
 0x4a6   :  { %v557_v22 = vpack.c.bf16 %v556_v20, %v556_v20 }
 0x4a7   :  { %v831_v23 = vpop.f32.mrf.mxu1 }
 0x4a8   :  { %849 = vmatmul.mubr.bf16.vlgmr.msra.gmra.mxu0 %v557_v22 }
 0x568   :  { %v657_v1 = vpop.f32.mrf.mxu0 }
 0x569   :  { %v658_v25 = vadd.f32 %v657_v1, %v574_v24 }
 0x56a   :  { %v850_v26 = vpop.f32.mrf.mxu0 }
 0x56b   :  { %663 = vst [vmem:[#allocation9] sm:$0x1] %v658_v25 }
 0x56c   :  { %v660_v27 = vpop.f32.mrf.mxu0 }
 0x56d   :  { %966 = shalt.err (!%p963_p5)
}
 0x56e   :  { %673 = dma.vmem_to_hbm [thread:$0]  %s671_s21, 16, %s1142_s10, [#allocation5]   ;;  %v851_v28 = vpop.f32.mrf.mxu0 }
 0x56f   :  { %979 = dma.done.wait [#allocation5], 16  }
 0x570   :  { %980 = vsyncadd [#allocation5], 4294967280 }
 0x571   :  { %677 = vsyncpa [#allocation4], 1 }
 0x572   :  { %678 = vsyncpa [#allocation7], 1 }
 0x573   :  { %679 = vsyncpa [#allocation5], 1 }

</bundles_post_ra>
